<compile_context>
chip_gen: v7x
topology: tpu7x:2x2x1
jax: 0.10.0
libtpu: 0.0.40
codegen_flags: <defaults>
</compile_context>

<pallas_src>
import jax
import jax.numpy as jnp
from jax import lax
from jax.experimental import pallas as pl
from jax.experimental.pallas import tpu as pltpu


def _slab_copy_kernel(slab_ref, out_ref):
    # Entire forward pass of MockTEN: materialize the stored constants.
    # (With input/output aliasing this is a near-free in-place touch.)
    out_ref[...] = slab_ref[...]


def mock_ten_forward(nodes, adj, X, *, delta, types, Cidx, Cnum):
    """Equivalent of MockTEN(delta, types, Cidx, Cnum).forward(nodes, adj, X)."""
    del nodes, adj, X  # forward ignores its runtime inputs, as in PyTorch.

    consts = (delta, types, Cidx, Cnum)
    for c in consts:
        assert c.ndim == 2 and c.shape[-1] == 128, "expect (rows, 128) constants"
        assert c.dtype.itemsize == 4, "expect 32-bit constants"

    # Fuse all constants into one lane-dense 32-bit slab (sublane axis concat).
    slab = jnp.concatenate(
        [lax.bitcast_convert_type(c, jnp.uint32) for c in consts], axis=0
    )  # shape (sum_rows, 128), uint32

    slab_bytes = slab.size * slab.dtype.itemsize

    out_slab = pl.pallas_call(
        _slab_copy_kernel,
        out_shape=jax.ShapeDtypeStruct(slab.shape, slab.dtype),
        in_specs=[pl.BlockSpec(memory_space=pltpu.MemorySpace.VMEM)],
        out_specs=pl.BlockSpec(memory_space=pltpu.MemorySpace.VMEM),
        # Output aliases the slab input: no fresh HBM output allocation.
        # The slab is freshly materialized above, so donating it is safe and
        # the caller's original delta/types/Cidx/Cnum buffers stay live.
        input_output_aliases={0: 0},
        cost_estimate=pl.CostEstimate(
            flops=0, transcendentals=0, bytes_accessed=2 * slab_bytes
        ),
    )(slab)

    # Split the slab back into the four constants with their original dtypes.
    outs = []
    row = 0
    for c in consts:
        rows = c.shape[0]
        piece = out_slab[row:row + rows, :]
        outs.append(lax.bitcast_convert_type(piece, c.dtype))
        row += rows
    return tuple(outs)


if __name__ == "__main__":
    key = jax.random.PRNGKey(0)
    k_delta, k_types, k_cidx, k_cnum, k_nodes, k_adj, k_x = jax.random.split(key, 7)

    # Constants stored by __init__ (small shapes, aligned to the TPU (8, 128) tile).
    delta = jax.random.normal(k_delta, (8, 128), dtype=jnp.float32)
    types = jax.random.randint(k_types, (8, 128), 0, 4, dtype=jnp.int32)
    Cidx = jax.random.randint(k_cidx, (8, 128), 0, 16, dtype=jnp.int32)
    Cnum = jax.random.randint(k_cnum, (8, 128), 1, 8, dtype=jnp.int32)

    # Runtime inputs (ignored by forward, present only for signature fidelity).
    batch, seq, hidden = 2, 8, 32
    nodes = jax.random.normal(k_nodes, (batch, seq, hidden), dtype=jnp.float32)
    adj = jax.random.normal(k_adj, (batch, seq, seq), dtype=jnp.float32)
    X = jax.random.normal(k_x, (batch, seq, hidden), dtype=jnp.float32)

    out_delta, out_types, out_cidx, out_cnum = jax.block_until_ready(
        mock_ten_forward(nodes, adj, X,
                         delta=delta, types=types, Cidx=Cidx, Cnum=Cnum))

    assert out_delta.dtype == delta.dtype and out_delta.shape == delta.shape
    assert out_types.dtype == types.dtype and out_types.shape == types.shape
    assert out_cidx.dtype == Cidx.dtype and out_cidx.shape == Cidx.shape
    assert out_cnum.dtype == Cnum.dtype and out_cnum.shape == Cnum.shape
    assert jnp.array_equal(out_delta, delta)
    assert jnp.array_equal(out_types, types)
    assert jnp.array_equal(out_cidx, Cidx)
    assert jnp.array_equal(out_cnum, Cnum)

    print("KERNEL_OK")
</pallas_src>

<mosaic_0001>
module attributes {stable_mosaic.version = 11 : i64} {
  func.func @_slab_copy_kernel(%arg0: memref<32x128xi32, #tpu.memory_space<vmem>>, %arg1: memref<32x128xi32, #tpu.memory_space<vmem>>) attributes {dimension_semantics = [], scalar_prefetch = 0 : i64, scratch_operands = 0 : i64, tpu.core_type = #tpu.core_type<tc>} {
    %c0 = arith.constant 0 : index
    %c0_0 = arith.constant 0 : index
    %0 = vector.load %arg0[%c0, %c0_0] : memref<32x128xi32, #tpu.memory_space<vmem>>, vector<32x128xi32>
    %c0_1 = arith.constant 0 : index
    %c0_2 = arith.constant 0 : index
    %1 = vector.load %arg1[%c0_1, %c0_2] : memref<32x128xi32, #tpu.memory_space<vmem>>, vector<32x128xi32>
    tpu.vector_store %arg1[%c0_1, %c0_2], %0 {strides = array<i32>} : memref<32x128xi32, #tpu.memory_space<vmem>>, vector<32x128xi32>,
    return
  }
}

</mosaic_0001>

<bundles_post_ra>
// kernel: tpu_custom_call.1
= control target key start
LH: loop header
LB: loop body
LE: loop exit
PB: predicated region body
PF: predicated region fallthrough
CT: control target
= control target key end

     0   :  { %6 = vsyncpa [#allocation3], 0  ;;  %s144_s0 = inlined_call_operand.hbm [shape: u32[32,128], index: 0, kind: input, shape index: {}, may-alias: {0,1}]   ;;  %s145_s1 = inlined_call_operand.hbm [shape: u32[32,128], index: 1, kind: output, shape index: {}, may-alias: {0,1}]  }
   0x1   :  { %7 = vsyncpa [#allocation4], 0  ;;  %s100_s6 = smov [#allocation2]   ;;  %s52_s10 = scalar_lea.hbm %s144_s0, 512 }
   0x2   :  { %s13_s7 = sshll.u32 %s100_s6, 4  ;;  %p53_p0 = scmp.ne.s32.totalorder %s144_s0, %s52_s10  ;;  %s14_s7 = int_to_ptr.vmem [resolvable:$true] %s13_s7 }
   0x3   :  { %p56_p1 = scmp.lt.u32.totalorder %s52_s10, %s144_s0 }
   0x5   :  { %p58_p2 = pnand %p56_p1, %p53_p0 }
   0x7   :  { %61 = shalt.err (!%p58_p2)
}
   0x8   :  { %s62_s15 = scalar_lea.vmem %s14_s7, 512  ;;  %p67_p4 = scmp.lt.s32.totalorder %s14_s7, %s14_s7 }
   0x9   :  { %p63_p3 = scmp.ne.s32.totalorder %s14_s7, %s62_s15  ;;  %p68_p5 = scmp.lt.s32.totalorder %s62_s15, %s62_s15 }
   0xb   :  { %p69_p6 = por %p68_p5, %p67_p4 }
   0xd   :  { %p70_p7 = pnand %p69_p6, %p63_p3 }
   0xf   :  { %73 = shalt.err (!%p70_p7)
}
  0x10   :  { %s101_s16 = smov 128   ;;  %s102_s17 = smov 8  }
  0x11   :  { %19 = dma.hbm_to_vmem [thread:$0]  %s144_s0, 512, %s14_s7, [#allocation3], %s101_s16, %s101_s16, %s102_s17  }
  0x12   :  { %96 = dma.done.wait [#allocation3], 512  }
  0x13   :  { %97 = vsyncadd [#allocation3], 4294966784  ;;  %s103_s20 = smov [#allocation5]   ;;  %v23_v0 = vld [vmem:[#allocation2] sm:$0xff]  ;;  %v24_v1 = vld [vmem:[#allocation2 + $0x8] sm:$0xff] }
  0x14   :  { %s36_s21 = sshll.u32 %s103_s20, 4  ;;  %v25_v2 = vld [vmem:[#allocation2 + $0x10] sm:$0xff]  ;;  %27 = vst [vmem:[#allocation5] sm:$0xff] %v23_v0  ;;  %28 = vst [vmem:[#allocation5 + $0x8] sm:$0xff] %v24_v1  ;;  %v26_v3 = vld [vmem:[#allocation2 + $0x18] sm:$0xff]  ;;  %s37_s21 = int_to_ptr.vmem [resolvable:$true] %s36_s21 }
  0x15   :  { %29 = vst [vmem:[#allocation5 + $0x10] sm:$0xff] %v25_v2  ;;  %30 = vst [vmem:[#allocation5 + $0x18] sm:$0xff] %v26_v3  ;;  %s74_s22 = scalar_lea.vmem %s37_s21, 512  ;;  %p79_p9 = scmp.lt.s32.totalorder %s37_s21, %s37_s21 }
  0x16   :  { %p75_p8 = scmp.ne.s32.totalorder %s37_s21, %s74_s22  ;;  %p80_p10 = scmp.lt.s32.totalorder %s74_s22, %s74_s22 }
  0x18   :  { %p81_p11 = por %p80_p10, %p79_p9 }
  0x1a   :  { %p82_p12 = pnand %p81_p11, %p75_p8 }
  0x1c   :  { %85 = shalt.err (!%p82_p12)
}
  0x1d   :  { %s86_s24 = scalar_lea.hbm %s145_s1, 512 }
  0x1e   :  { %p87_p13 = scmp.ne.s32.totalorder %s145_s1, %s86_s24  ;;  %p90_p0 = scmp.lt.u32.totalorder %s86_s24, %s145_s1 }
  0x20   :  { %p92_p1 = pnand %p90_p0, %p87_p13 }
  0x22   :  { %95 = shalt.err (!%p92_p1)
}
  0x23   :  { %42 = dma.vmem_to_hbm [thread:$0]  %s37_s21, 512, %s145_s1, [#allocation4], %s101_s16, %s101_s16, %s102_s17  }
  0x24   :  { %98 = dma.done.wait [#allocation4], 512  }
  0x25   :  { %99 = vsyncadd [#allocation4], 4294966784 }
  0x26   :  { %46 = vsyncpa [#allocation3], 1 }
  0x27   :  { %47 = vsyncpa [#allocation4], 1 }

</bundles_post_ra>
